<compile_context>
chip_gen: v7x
topology: tpu7x:2x2x1
jax: 0.10.0
libtpu: 0.0.40
codegen_flags: <defaults>
</compile_context>

<pallas_src>
import math

import jax
import jax.numpy as jnp
from jax.experimental import pallas as pl
from jax.experimental.pallas import tpu as pltpu


def _weighting_kernel(x_ref, w_ref, o_ref):
    # x_ref: (tm, td) tile of (folded) rows; w_ref: (1, td) weight row in the output dtype.
    # Promote x to the output/compute dtype (matches torch type promotion), multiply with
    # a sublane broadcast of the weight row, store.  Pure VPU work; HBM-bandwidth bound.
    o_ref[...] = x_ref[...].astype(o_ref.dtype) * w_ref[...]


def _weighted_2d(xk: jax.Array, wk: jax.Array, out_dtype) -> jax.Array:
    """xk: (mw, dw) with dw % 128 == 0 (lane-dense); wk: (1, dw).  Returns xk * wk."""
    mw, dw = xk.shape
    bytes_x = jnp.dtype(xk.dtype).itemsize
    bytes_o = jnp.dtype(out_dtype).itemsize
    per_elem = bytes_x + bytes_o

    # Sublane granularity of the input dtype: 8 rows for 32-bit, 16 for 16-bit, 32 for 8-bit.
    sub = max(8, 32 // max(1, bytes_x))

    # Per-step budget for one (x tile + out tile) pair.  total//8 naturally targets >= 8
    # grid steps (>= 4 per v7x TensorCore) on mid-sized inputs; the clamps keep tiny
    # inputs at a single step and cap huge ones at ~8 MiB x-tiles (v5e/v6e are already at
    # roofline with >= 4 MiB tiles, so the larger cap only helps v7x and never hurts).
    pair_budget = min(16 << 20, max(1 << 20, (mw * dw * per_elem) // 8))
    elem_budget = max(sub * 128, pair_budget // per_elem)  # elements per (tm, td) tile

    # Feature-axis tiling only when a single sublane group of full-width rows would blow
    # the budget (very wide folded rows) -- keeps every shape compileable while staying
    # lane-dense and keeping the weight block resident per feature column.
    if sub * dw <= elem_budget:
        td = dw
    else:
        td = max(128, ((elem_budget // sub) // 128) * 128)
    grid_d = pl.cdiv(dw, td)

    rows_cap = max(sub, ((elem_budget // td) // sub) * sub)
    if rows_cap >= mw:
        tm = mw  # full extent is always a legal block dim (no (8,128) constraint)
    else:
        tm = rows_cap
    grid_m = pl.cdiv(mw, tm)

    # Best-effort: even number of row steps so v7x's two TensorCores split evenly.
    if grid_m > 1 and grid_m % 2 == 1 and tm > sub:
        t = tm
        for _ in range(8):
            t -= sub
            if t < sub:
                break
            g = pl.cdiv(mw, t)
            if g % 2 == 0:
                tm, grid_m = t, g
                break
            if g > grid_m + 8:
                break

    # VMEM: double-buffered (x + out) tiles + weight row (2 buffers) + headroom.
    vmem_bytes = 2 * tm * td * per_elem + 2 * td * bytes_o + (4 << 20)
    vmem_bytes = int(min(max(vmem_bytes, 8 << 20), 40 << 20))

    cost = pl.CostEstimate(
        flops=mw * dw,
        transcendentals=0,
        bytes_accessed=mw * dw * per_elem + dw * bytes_o,
    )

    return pl.pallas_call(
        _weighting_kernel,
        out_shape=jax.ShapeDtypeStruct((mw, dw), out_dtype),
        grid=(grid_m, grid_d),
        in_specs=[
            pl.BlockSpec((tm, td), lambda i, j: (i, j)),  # x row tile
            pl.BlockSpec((1, td), lambda i, j: (0, j)),   # weight row (resident per column)
        ],
        out_specs=pl.BlockSpec((tm, td), lambda i, j: (i, j)),
        compiler_params=pltpu.CompilerParams(
            dimension_semantics=("parallel", "parallel"),
            vmem_limit_bytes=vmem_bytes,
        ),
        cost_estimate=cost,
    )(xk, wk)


def last_dim_weighting(x: jax.Array, weight: jax.Array) -> jax.Array:
    """Computes x * weight, broadcasting weight over the last dim of x."""
    orig_shape = x.shape
    d = int(orig_shape[-1])
    assert weight.shape == (d,), "weight must match feature_dim (last dim of x)"

    # Torch type-promotion semantics (e.g. bf16 x * fp32 weight -> fp32 result).
    out_dtype = jnp.result_type(x.dtype, weight.dtype)
    w = weight.astype(out_dtype)

    x2d = x.reshape(-1, d)  # free row-major relabel
    m = x2d.shape[0]

    if m == 0 or d == 0:
        return (x2d.astype(out_dtype) * w).reshape(orig_shape)

    # Lane-dense fold: smallest r with (r * d) % 128 == 0 (r == 1 when d is already
    # a multiple of 128).
    r = 1 if d % 128 == 0 else 128 // math.gcd(d, 128)
    main = (m // r) * r  # rows that fold with a FREE reshape

    if main == 0:
        # Fewer rows than one fold group: trivially small, plain JAX is fastest.
        return (x2d.astype(out_dtype) * w).reshape(orig_shape)

    dw = d * r
    wk = (jnp.tile(w, r) if r > 1 else w).reshape(1, dw)

    xk = x2d if main == m else x2d[:main, :]
    xk = xk.reshape(main // r, dw)  # free reshape (row-major, main % r == 0)
    out_main = _weighted_2d(xk, wk, out_dtype).reshape(main, d)

    if main == m:
        out2d = out_main
    else:
        # Tail of < r rows (< 128 rows): negligible work, handled in plain JAX so the
        # kernel path stays lane-dense for any m.  (The concat copy is bounded by the
        # output size and only triggers when m % fold != 0.)
        tail = x2d[main:, :].astype(out_dtype) * w
        out2d = jnp.concatenate([out_main, tail], axis=0)

    return out2d.reshape(orig_shape)


if __name__ == "__main__":
    key = jax.random.PRNGKey(0)
    kx1, kw, kx2, kx3, kw3 = jax.random.split(key, 5)

    feature_dim = 32
    # PyTorch module initializes weight = ones(feature_dim); perturb deterministically so
    # the check is non-trivial while staying shape-consistent with the init.
    weight = jnp.ones((feature_dim,), dtype=jnp.float32) + 0.01 * jax.random.normal(
        kw, (feature_dim,), dtype=jnp.float32
    )

    # 1) Module-consistent small shape [batch, seq, feature_dim]; exercises the row fold
    #    (32-wide rows folded 4x into 128-wide lane-dense kernel rows), single grid step.
    x1 = jax.random.normal(kx1, (2, 8, feature_dim), dtype=jnp.float32)
    out1 = jax.block_until_ready(last_dim_weighting(x1, weight))
    assert out1.shape == x1.shape
    assert jnp.allclose(out1, x1 * weight, atol=1e-6, rtol=1e-6)

    # 2) Row count not divisible by the fold (m = 21, fold = 4): folded main + tiny tail.
    x2 = jax.random.normal(kx2, (3, 7, feature_dim), dtype=jnp.float32)
    out2 = jax.block_until_ready(last_dim_weighting(x2, weight))
    assert out2.shape == x2.shape
    assert jnp.allclose(out2, x2 * weight, atol=1e-6, rtol=1e-6)

    # 3) d = 100 (fold = 32): multi-step ragged row grid with the even-step nudge.
    d3 = 100
    w3 = jnp.ones((d3,), dtype=jnp.float32) + 0.01 * jax.random.normal(
        kw3, (d3,), dtype=jnp.float32
    )
    x3 = jax.random.normal(kx3, (8, 1000, d3), dtype=jnp.float32)
    out3 = jax.block_until_ready(last_dim_weighting(x3, w3))
    assert out3.shape == x3.shape
    assert jnp.allclose(out3, x3 * w3, atol=1e-6, rtol=1e-6)

    print("KERNEL_OK")
</pallas_src>

<mosaic_0001>
module attributes {stable_mosaic.version = 11 : i64} {
  func.func @_weighting_kernel(%arg0: i32, %arg1: i32, %arg2: memref<4x128xf32, #tpu.memory_space<vmem>>, %arg3: memref<1x128xf32, #tpu.memory_space<vmem>>, %arg4: memref<4x128xf32, #tpu.memory_space<vmem>>) attributes {dimension_semantics = [#tpu.dimension_semantics<parallel>, #tpu.dimension_semantics<parallel>], iteration_bounds = array<i64: 1, 1>, scalar_prefetch = 0 : i64, scratch_operands = 0 : i64, tpu.core_type = #tpu.core_type<tc>, window_params = [{transform_indices = @transform_0, window_bounds = array<i64: 4, 128>}, {transform_indices = @transform_1, window_bounds = array<i64: 1, 128>}, {transform_indices = @transform_2, window_bounds = array<i64: 4, 128>}]} {
    %c0 = arith.constant 0 : index
    %c0_0 = arith.constant 0 : index
    %0 = vector.load %arg2[%c0, %c0_0] : memref<4x128xf32, #tpu.memory_space<vmem>>, vector<4x128xf32>
    %c0_1 = arith.constant 0 : index
    %c0_2 = arith.constant 0 : index
    %1 = vector.load %arg3[%c0_1, %c0_2] : memref<1x128xf32, #tpu.memory_space<vmem>>, vector<1x128xf32>
    %2 = vector.broadcast %1 : vector<1x128xf32> to vector<4x128xf32>
    %3 = arith.mulf %0, %2 : vector<4x128xf32>
    %c0_3 = arith.constant 0 : index
    %c0_4 = arith.constant 0 : index
    %4 = vector.load %arg4[%c0_3, %c0_4] : memref<4x128xf32, #tpu.memory_space<vmem>>, vector<4x128xf32>
    tpu.vector_store %arg4[%c0_3, %c0_4], %3 {strides = array<i32>} : memref<4x128xf32, #tpu.memory_space<vmem>>, vector<4x128xf32>,
    return
  }
  func.func @transform_0(%arg0: i32, %arg1: i32) -> (i32, i32) {
    %c0_i32 = arith.constant 0 : i32
    return %arg0, %arg1 : i32, i32
  }
  func.func @transform_1(%arg0: i32, %arg1: i32) -> (i32, i32) {
    %c0_i32 = arith.constant 0 : i32
    %c0_i32_0 = arith.constant 0 : i32
    return %c0_i32, %arg1 : i32, i32
  }
  func.func @transform_2(%arg0: i32, %arg1: i32) -> (i32, i32) {
    %c0_i32 = arith.constant 0 : i32
    return %arg0, %arg1 : i32, i32
  }
}

</mosaic_0001>

<bundles_post_ra>
// kernel: tpu_custom_call.1
= control target key start
LH: loop header
LB: loop body
LE: loop exit
PB: predicated region body
PF: predicated region fallthrough
CT: control target
= control target key end

     0   :  { %7 = vsyncpa [#allocation3], 0  ;;  %s144_s0 = inlined_call_operand.hbm [shape: f32[4,128], index: 0, kind: input, shape index: {}]   ;;  %s145_s1 = inlined_call_operand.vmem [shape: f32[1,128], index: 1, kind: input, shape index: {}]   ;;  %s146_s2 = inlined_call_operand.hbm [shape: f32[4,128], index: 2, kind: output, shape index: {}]  }
   0x1   :  { %8 = vsyncpa [#allocation4], 0  ;;  %s100_s9 = smov [#allocation2]   ;;  %s52_s13 = scalar_lea.hbm %s144_s0, 64 }
   0x2   :  { %s15_s10 = sshll.u32 %s100_s9, 4  ;;  %p53_p0 = scmp.ne.s32.totalorder %s144_s0, %s52_s13  ;;  %s16_s10 = int_to_ptr.vmem [resolvable:$true] %s15_s10 }
   0x3   :  { %p56_p1 = scmp.lt.u32.totalorder %s52_s13, %s144_s0 }
   0x5   :  { %p58_p2 = pnand %p56_p1, %p53_p0 }
   0x7   :  { %61 = shalt.err (!%p58_p2)
}
   0x8   :  { %s62_s18 = scalar_lea.vmem %s16_s10, 64  ;;  %p67_p4 = scmp.lt.s32.totalorder %s16_s10, %s16_s10 }
   0x9   :  { %p63_p3 = scmp.ne.s32.totalorder %s16_s10, %s62_s18  ;;  %p68_p5 = scmp.lt.s32.totalorder %s62_s18, %s62_s18 }
   0xb   :  { %p69_p6 = por %p68_p5, %p67_p4 }
   0xd   :  { %p70_p7 = pnand %p69_p6, %p63_p3 }
   0xf   :  { %73 = shalt.err (!%p70_p7)
}
  0x10   :  { %18 = dma.hbm_to_vmem [thread:$0]  %s144_s0, 64, %s16_s10, [#allocation3]  }
  0x11   :  { %96 = dma.done.wait [#allocation3], 64  }
  0x12   :  { %97 = vsyncadd [#allocation3], 4294967232  ;;  %s101_s21 = smov [#allocation5]   ;;  %v24_v0 = vld [vmem:[#allocation2] sm:$0xf] }
  0x13   :  { %s40_s22 = sshll.u32 %s101_s21, 4  ;;  %v49_v1 = vld [vmem:[%s145_s1] ss:$0 sm:$0xff]  ;;  %s41_s22 = int_to_ptr.vmem [resolvable:$true] %s40_s22 }
  0x14   :  { %v32_v2 = vmul.f32 %v49_v1, %v24_v0  ;;  %s74_s25 = scalar_lea.vmem %s41_s22, 64  ;;  %p79_p9 = scmp.lt.s32.totalorder %s41_s22, %s41_s22 }
  0x15   :  { %p75_p8 = scmp.ne.s32.totalorder %s41_s22, %s74_s25  ;;  %p80_p10 = scmp.lt.s32.totalorder %s74_s25, %s74_s25 }
  0x16   :  { %33 = vst [vmem:[#allocation5] sm:$0xf] %v32_v2 }
  0x17   :  { %p81_p11 = por %p80_p10, %p79_p9 }
  0x19   :  { %p82_p12 = pnand %p81_p11, %p75_p8 }
  0x1b   :  { %85 = shalt.err (!%p82_p12)
}
  0x1c   :  { %s86_s27 = scalar_lea.hbm %s146_s2, 64 }
  0x1d   :  { %p87_p13 = scmp.ne.s32.totalorder %s146_s2, %s86_s27  ;;  %p90_p0 = scmp.lt.u32.totalorder %s86_s27, %s146_s2 }
  0x1f   :  { %p92_p1 = pnand %p90_p0, %p87_p13 }
  0x21   :  { %95 = shalt.err (!%p92_p1)
}
  0x22   :  { %43 = dma.vmem_to_hbm [thread:$0]  %s41_s22, 64, %s146_s2, [#allocation4]  }
  0x23   :  { %98 = dma.done.wait [#allocation4], 64  }
  0x24   :  { %99 = vsyncadd [#allocation4], 4294967232 }
  0x25   :  { %47 = vsyncpa [#allocation3], 1 }
  0x26   :  { %48 = vsyncpa [#allocation4], 1 }

</bundles_post_ra>
